<compile_context>
chip_gen: v7x
topology: tpu7x:2x2x1
jax: 0.10.0
libtpu: 0.0.40
codegen_flags: <defaults>
</compile_context>

<pallas_src>
import numpy as np
import jax
import jax.numpy as jnp
from jax.experimental import pallas as pl
from jax.experimental.pallas import tpu as pltpu

# ----------------------------- configuration (small) ------------------------------
BATCH = 2
FEATURE_DIM = 32          # feature_dim (C)  [module default 768, shrunk for the demo]
PATCH_SIZE = 14
FEAT_H = FEAT_W = 16      # backbone feature map spatial size
NUM_OBJECTS = 10
PERSON_CATEGORY_ID = 1
MLP_H1, MLP_H2, NUM_REL = 512, 256, 117
NUM_REL_PAD = 128         # lane-dense padded MLP output width
IMG_H = IMG_W = FEAT_H * PATCH_SIZE   # 224


def _round_up(x, m):
    return ((x + m - 1) // m) * m


# ===================== fused Pallas kernel: pool + pair-gather + MLP ===============
def _fused_hoi_kernel(wmap_ref, feat_ref, selh_ref, selo_ref,
                      w1h_ref, w1o_ref, b1_ref, w2_ref, b2_ref, w3_ref, b3_ref,
                      o_ref):
    # Stage 1: roi_align(1,1) on the implicitly-upsampled map, expressed as one
    # weighted-pooling matmul over the ORIGINAL NHWC features.
    pooled = jnp.dot(wmap_ref[...], feat_ref[...],
                     preferred_element_type=jnp.float32)                  # (R_pad, C)
    pooled = pooled.astype(jnp.bfloat16)
    # Stage 2: (human, object) pair gather via one-hot selection matmuls.
    ph = jnp.dot(selh_ref[...], pooled,
                 preferred_element_type=jnp.float32).astype(jnp.bfloat16)  # (P_pad, C)
    po = jnp.dot(selo_ref[...], pooled,
                 preferred_element_type=jnp.float32).astype(jnp.bfloat16)  # (P_pad, C)
    # Stage 3: relation MLP (w1 pre-split into human/object halves -> no lane concat).
    h = (jnp.dot(ph, w1h_ref[...], preferred_element_type=jnp.float32)
         + jnp.dot(po, w1o_ref[...], preferred_element_type=jnp.float32)
         + b1_ref[...])
    h = jnp.maximum(h, 0.0).astype(jnp.bfloat16)
    h = jnp.dot(h, w2_ref[...], preferred_element_type=jnp.float32) + b2_ref[...]
    h = jnp.maximum(h, 0.0).astype(jnp.bfloat16)
    o_ref[...] = jnp.dot(h, w3_ref[...], preferred_element_type=jnp.float32) + b3_ref[...]


def fused_hoi_call(wmap, feat, selh, selo, w1h, w1o, b1, w2, b2, w3, b3):
    P_pad = selh.shape[0]
    args = (wmap, feat, selh, selo, w1h, w1o, b1, w2, b2, w3, b3)
    in_specs = [pl.BlockSpec(a.shape, lambda i: (0, 0)) for a in args]
    return pl.pallas_call(
        _fused_hoi_kernel,
        out_shape=jax.ShapeDtypeStruct((P_pad, NUM_REL_PAD), jnp.float32),
        grid=(1,),
        in_specs=in_specs,
        out_specs=pl.BlockSpec((P_pad, NUM_REL_PAD), lambda i: (0, 0)),
        compiler_params=pltpu.CompilerParams(dimension_semantics=("arbitrary",)),
    )(*args)


# ====================== effective ROI weight maps (upsample folded) ===============
def _interp_matrix(n_in, n_out):
    # align_corners=True bilinear interpolation matrix (n_out, n_in)
    out = np.arange(n_out, dtype=np.float64)
    src = out * (n_in - 1) / (n_out - 1)
    i0 = np.clip(np.floor(src).astype(np.int64), 0, n_in - 1)
    i1 = np.minimum(i0 + 1, n_in - 1)
    w1 = (src - i0).astype(np.float32)
    w0 = 1.0 - w1
    A = np.zeros((n_out, n_in), dtype=np.float32)
    A[np.arange(n_out), i0] += w0
    A[np.arange(n_out), i1] += w1
    return jnp.asarray(A)


def _build_upsampled_roi_weights(rois, Hup, Wup):
    """Per-ROI weight map over the (Hup, Wup) upsampled grid reproducing
    torchvision.ops.roi_align(output_size=(1,1), spatial_scale=1,
    sampling_ratio=-1, aligned=False).

    NOTE on coordinate order: the PyTorch reference builds rois as
    [idx, ymin, xmin, ymax, xmax] and hands that straight to torchvision, which
    reads columns 1..4 as [x1, y1, x2, y2].  We reproduce that behavior exactly
    (columns 1..4 interpreted in torchvision order), matching the reference.
    """
    MAXG = max(Hup, Wup)

    def one_roi(roi):
        img = roi[0].astype(jnp.int32)
        x1, y1, x2, y2 = roi[1], roi[2], roi[3], roi[4]
        roi_w = jnp.maximum(x2 - x1, 1.0)
        roi_h = jnp.maximum(y2 - y1, 1.0)
        gh = jnp.ceil(roi_h).astype(jnp.int32)
        gw = jnp.ceil(roi_w).astype(jnp.int32)
        count = (gh * gw).astype(jnp.float32)

        iy = jnp.arange(MAXG)
        ix = jnp.arange(MAXG)
        ys = y1 + (iy.astype(jnp.float32) + 0.5) * roi_h / gh.astype(jnp.float32)
        xs = x1 + (ix.astype(jnp.float32) + 0.5) * roi_w / gw.astype(jnp.float32)
        ymask = iy < gh
        xmask = ix < gw

        yy = jnp.repeat(ys, MAXG)
        xx = jnp.tile(xs, MAXG)
        mm = (jnp.repeat(ymask, MAXG) & jnp.tile(xmask, MAXG)).astype(jnp.float32)

        valid = (yy >= -1.0) & (yy <= Hup) & (xx >= -1.0) & (xx <= Wup)
        y = jnp.clip(yy, 0.0, None)
        x = jnp.clip(xx, 0.0, None)
        y_low0 = jnp.floor(y).astype(jnp.int32)
        x_low0 = jnp.floor(x).astype(jnp.int32)
        y_low = jnp.minimum(y_low0, Hup - 1)
        x_low = jnp.minimum(x_low0, Wup - 1)
        y_high = jnp.minimum(y_low + 1, Hup - 1)
        x_high = jnp.minimum(x_low + 1, Wup - 1)
        y = jnp.where(y_low0 >= Hup - 1, jnp.float32(Hup - 1), y)
        x = jnp.where(x_low0 >= Wup - 1, jnp.float32(Wup - 1), x)
        ly = y - y_low.astype(jnp.float32)
        lx = x - x_low.astype(jnp.float32)
        hy = 1.0 - ly
        hx = 1.0 - lx
        vm = valid.astype(jnp.float32) * mm
        w1 = hy * hx * vm
        w2 = hy * lx * vm
        w3 = ly * hx * vm
        w4 = ly * lx * vm

        flat = jnp.zeros((Hup * Wup,), jnp.float32)
        flat = flat.at[y_low * Wup + x_low].add(w1)
        flat = flat.at[y_low * Wup + x_high].add(w2)
        flat = flat.at[y_high * Wup + x_low].add(w3)
        flat = flat.at[y_high * Wup + x_high].add(w4)
        flat = flat / count
        return flat, img

    return jax.vmap(one_roi)(rois)


def build_effective_weight_maps(rois, B, H, W):
    """Fold the x2 bilinear upsample into the ROI weight map: returns (R, B*H*W)
    weights over the ORIGINAL feature grid in NHWC-flattened order."""
    H2, W2 = 2 * H, 2 * W
    ah = _interp_matrix(H, H2)            # (H2, H)
    aw = _interp_matrix(W, W2)            # (W2, W)
    flat_up, img = _build_upsampled_roi_weights(rois, H2, W2)   # (R, H2*W2), (R,)
    w_up = flat_up.reshape(-1, H2, W2)
    # W_eff[r] = Ah^T @ W_up[r] @ Aw
    w_eff = jnp.einsum('rpq,py,qx->ryx', w_up, ah, aw)           # (R, H, W)
    onehot = jax.nn.one_hot(img, B, dtype=jnp.float32)           # (R, B)
    full = onehot[:, :, None] * w_eff.reshape(w_eff.shape[0], 1, H * W)
    return full.reshape(w_eff.shape[0], B * H * W)


# ================================ MLP parameters ===================================
def init_mlp_params(key):
    def linear(key, fan_in, fan_out):
        k1, k2 = jax.random.split(key)
        bound = 1.0 / np.sqrt(fan_in)
        w = jax.random.uniform(k1, (fan_in, fan_out), jnp.float32, -bound, bound)
        b = jax.random.uniform(k2, (1, fan_out), jnp.float32, -bound, bound)
        return w, b

    k1, k2, k3 = jax.random.split(key, 3)
    w1, b1 = linear(k1, 2 * FEATURE_DIM, MLP_H1)
    w2, b2 = linear(k2, MLP_H1, MLP_H2)
    w3, b3 = linear(k3, MLP_H2, NUM_REL)
    return (w1, b1, w2, b2, w3, b3)


def prepare_mlp_operands(mlp_params):
    """Pre-split w1 into human/object halves, pad the output layer 117->128,
    cast weights to bf16 (biases stay f32, added to the f32 accumulator)."""
    w1, b1, w2, b2, w3, b3 = mlp_params
    C = FEATURE_DIM
    w1h = w1[:C].astype(jnp.bfloat16)
    w1o = w1[C:].astype(jnp.bfloat16)
    w2b = w2.astype(jnp.bfloat16)
    w3p = jnp.pad(w3, ((0, 0), (0, NUM_REL_PAD - NUM_REL))).astype(jnp.bfloat16)
    b3p = jnp.pad(b3, ((0, 0), (0, NUM_REL_PAD - NUM_REL)))
    return w1h, w1o, b1, w2b, b2, w3p, b3p


# ================================ host-side glue ==================================
def prepare_rois_host(detections_batch, targets, patch_size):
    """Mirrors HOIModel_profiler.prepare_rois_cpu (numpy, host-side).
    Replicates the reference's column ordering [idx, ymin, xmin, ymax, xmax]."""
    scale_factor = patch_size / 2
    all_rois, all_info, counts = [], [], []
    for image_index, (det, tgt) in enumerate(zip(detections_batch, targets)):
        boxes = np.asarray(det["boxes"], np.float32)
        counts.append(len(boxes))
        if boxes.size == 0:
            continue
        H, W = tgt["size"]
        cx, cy, bw, bh = boxes.T
        xmin = (cx - bw / 2) * W
        ymin = (cy - bh / 2) * H
        xmax = (cx + bw / 2) * W
        ymax = (cy + bh / 2) * H
        sxmin, symin, sxmax, symax = (v / scale_factor for v in (xmin, ymin, xmax, ymax))
        rois = np.stack([np.full_like(symin, image_index), symin, sxmin, symax, sxmax], axis=1)
        all_rois.append(rois)
        for lbl, roi, sc in zip(det["labels"], rois, det["scores"]):
            all_info.append({
                "label": int(lbl),
                "bbox": [roi[2] * scale_factor, roi[1] * scale_factor,
                         roi[4] * scale_factor, roi[3] * scale_factor],
                "image_index": image_index,
                "score": float(sc),
            })
    rois_tensor = np.concatenate(all_rois, axis=0) if all_rois else np.zeros((0, 5), np.float32)
    return rois_tensor.astype(np.float32), all_info, counts


def build_pairs(additional_info, detection_counts, num_objects, person_id):
    """Mirrors the human/object pairing loop; returns global (human, object) index pairs."""
    pair_h, pair_o, hoi_results, pair_start_indices = [], [], [], []
    current_index = 0
    offset = 0
    for count in detection_counts:
        idxs = list(range(offset, offset + count))
        infos = additional_info[offset:offset + count]
        humans = [(i, d) for i, d in zip(idxs, infos) if d["label"] == person_id]
        objects = [(i, d) for i, d in zip(idxs, infos) if d["label"] != person_id]
        humans.sort(key=lambda x: -x[1]["score"])
        objects.sort(key=lambda x: -x[1]["score"])
        if num_objects is not None:
            humans = humans[:num_objects]
            objects = objects[:num_objects]
        pair_start_indices.append(current_index)
        for hi, hinfo in humans:
            for oi, oinfo in objects:
                pair_h.append(hi)
                pair_o.append(oi)
                hoi_results.append({
                    "subject_category": hinfo["label"], "subject_score": hinfo["score"],
                    "subject_bbox": hinfo["bbox"],
                    "object_category": oinfo["label"], "object_score": oinfo["score"],
                    "object_bbox": oinfo["bbox"],
                })
                current_index += 1
        offset += count
    return np.array(pair_h, np.int32), np.array(pair_o, np.int32), hoi_results, pair_start_indices


def _selection_matrix(idx, n_rows_padded, n_cols_padded):
    sel = np.zeros((n_rows_padded, n_cols_padded), np.float32)
    if idx.size:
        sel[np.arange(idx.size), idx] = 1.0
    return sel


def hoi_forward(features_nhwc, detections_batch, targets, mlp_params):
    # TODO(synk): external `backbone` module is not part of this kernel; features are its output.
    batch_size, H, W, C = features_nhwc.shape

    rois_np, additional_info, detection_counts = prepare_rois_host(
        detections_batch, targets, PATCH_SIZE)
    if rois_np.shape[0] == 0:
        return [[] for _ in range(batch_size)], None

    h_idx, o_idx, hoi_results, pair_start_indices = build_pairs(
        additional_info, detection_counts, NUM_OBJECTS, PERSON_CATEGORY_ID)
    if len(h_idx) == 0:
        return [[] for _ in range(batch_size)], None

    R = rois_np.shape[0]
    P = int(h_idx.shape[0])
    R_pad = _round_up(max(R, 8), 8)
    P_pad = _round_up(max(P, 8), 8)

    # Effective (upsample-folded) ROI weight maps on the original NHWC grid.
    wmap = build_effective_weight_maps(jnp.asarray(rois_np), batch_size, H, W)   # (R, B*H*W)
    wmap = jnp.pad(wmap, ((0, R_pad - R), (0, 0))).astype(jnp.bfloat16)

    # NHWC flattened: (B*H*W, C) — C is the lane dimension, no transpose needed.
    feat_flat = features_nhwc.reshape(batch_size * H * W, C).astype(jnp.bfloat16)

    # One-hot selection matrices for the pair gather (built on host, tiny).
    selh = jnp.asarray(_selection_matrix(h_idx, P_pad, R_pad)).astype(jnp.bfloat16)
    selo = jnp.asarray(_selection_matrix(o_idx, P_pad, R_pad)).astype(jnp.bfloat16)

    w1h, w1o, b1, w2b, b2, w3p, b3p = prepare_mlp_operands(mlp_params)

    out_padded = fused_hoi_call(wmap, feat_flat, selh, selo,
                                w1h, w1o, b1, w2b, b2, w3p, b3p)   # (P_pad, 128)
    relation_scores = out_padded[:P, :NUM_REL]                      # (P, 117)

    # Single device_get: needed anyway to populate the Python result dicts;
    # the NaN check (reference semantics) reuses that array — no extra sync.
    scores_np = np.asarray(jax.device_get(relation_scores))
    if np.isnan(scores_np).any():
        raise ValueError("NaN detected in relation_scores.")
    for i in range(scores_np.shape[0]):
        hoi_results[i]["relation_score"] = scores_np[i]

    image_hoi_results = []
    for i in range(len(pair_start_indices)):
        start_idx = pair_start_indices[i]
        end_idx = pair_start_indices[i + 1] if i + 1 < len(pair_start_indices) else scores_np.shape[0]
        image_hoi_results.append([] if start_idx == end_idx else hoi_results[start_idx:end_idx])
    return image_hoi_results, relation_scores


# ===================================== main =======================================
if __name__ == "__main__":
    key = jax.random.PRNGKey(0)
    k_feat, k_mlp = jax.random.split(key)

    # Synthetic backbone output (B, H, W, C) — kept NHWC end-to-end.
    features_nhwc = jax.random.normal(k_feat, (BATCH, FEAT_H, FEAT_W, FEATURE_DIM), jnp.float32)

    # Deterministic synthetic detections (cx, cy, w, h normalized) and targets.
    detections_batch = [
        {"boxes": np.array([[0.30, 0.40, 0.30, 0.50],
                            [0.60, 0.55, 0.25, 0.40],
                            [0.50, 0.50, 0.20, 0.20],
                            [0.70, 0.30, 0.15, 0.25]], np.float32),
         "labels": np.array([1, 1, 5, 7], np.int64),
         "scores": np.array([0.9, 0.7, 0.8, 0.6], np.float32)},
        {"boxes": np.array([[0.45, 0.45, 0.40, 0.60],
                            [0.25, 0.60, 0.20, 0.30],
                            [0.75, 0.65, 0.25, 0.35]], np.float32),
         "labels": np.array([1, 3, 3], np.int64),
         "scores": np.array([0.95, 0.5, 0.85], np.float32)},
    ]
    targets = [{"size": (IMG_H, IMG_W)}, {"size": (IMG_H, IMG_W)}]

    mlp_params = init_mlp_params(k_mlp)

    image_hoi_results, relation_scores = hoi_forward(
        features_nhwc, detections_batch, targets, mlp_params)

    jax.block_until_ready(relation_scores)
    assert relation_scores.shape == (6, NUM_REL)
    assert len(image_hoi_results) == BATCH
    assert all("relation_score" in r for img in image_hoi_results for r in img)
    print("KERNEL_OK")
</pallas_src>

<mosaic_0001>
module attributes {stable_mosaic.version = 11 : i64} {
  func.func @_fused_hoi_kernel(%arg0: i32, %arg1: memref<8x512xbf16, #tpu.memory_space<vmem>>, %arg2: memref<512x32xbf16, #tpu.memory_space<vmem>>, %arg3: memref<8x8xbf16, #tpu.memory_space<vmem>>, %arg4: memref<8x8xbf16, #tpu.memory_space<vmem>>, %arg5: memref<32x512xbf16, #tpu.memory_space<vmem>>, %arg6: memref<32x512xbf16, #tpu.memory_space<vmem>>, %arg7: memref<1x512xf32, #tpu.memory_space<vmem>>, %arg8: memref<512x256xbf16, #tpu.memory_space<vmem>>, %arg9: memref<1x256xf32, #tpu.memory_space<vmem>>, %arg10: memref<256x128xbf16, #tpu.memory_space<vmem>>, %arg11: memref<1x128xf32, #tpu.memory_space<vmem>>, %arg12: memref<8x128xf32, #tpu.memory_space<vmem>>) attributes {dimension_semantics = [#tpu.dimension_semantics<arbitrary>], iteration_bounds = array<i64: 1>, scalar_prefetch = 0 : i64, scratch_operands = 0 : i64, tpu.core_type = #tpu.core_type<tc>, window_params = [{pipeline_mode = #tpu.pipeline_mode<synchronous>, transform_indices = @transform_0, window_bounds = array<i64: 8, 512>}, {pipeline_mode = #tpu.pipeline_mode<synchronous>, transform_indices = @transform_1, window_bounds = array<i64: 512, 32>}, {pipeline_mode = #tpu.pipeline_mode<synchronous>, transform_indices = @transform_2, window_bounds = array<i64: 8, 8>}, {pipeline_mode = #tpu.pipeline_mode<synchronous>, transform_indices = @transform_3, window_bounds = array<i64: 8, 8>}, {pipeline_mode = #tpu.pipeline_mode<synchronous>, transform_indices = @transform_4, window_bounds = array<i64: 32, 512>}, {pipeline_mode = #tpu.pipeline_mode<synchronous>, transform_indices = @transform_5, window_bounds = array<i64: 32, 512>}, {pipeline_mode = #tpu.pipeline_mode<synchronous>, transform_indices = @transform_6, window_bounds = array<i64: 1, 512>}, {pipeline_mode = #tpu.pipeline_mode<synchronous>, transform_indices = @transform_7, window_bounds = array<i64: 512, 256>}, {pipeline_mode = #tpu.pipeline_mode<synchronous>, transform_indices = @transform_8, window_bounds = array<i64: 1, 256>}, {pipeline_mode = #tpu.pipeline_mode<synchronous>, transform_indices = @transform_9, window_bounds = array<i64: 256, 128>}, {pipeline_mode = #tpu.pipeline_mode<synchronous>, transform_indices = @transform_10, window_bounds = array<i64: 1, 128>}, {pipeline_mode = #tpu.pipeline_mode<synchronous>, transform_indices = @transform_11, window_bounds = array<i64: 8, 128>}]} {
    %c0 = arith.constant 0 : index
    %c0_0 = arith.constant 0 : index
    %0 = vector.load %arg1[%c0, %c0_0] : memref<8x512xbf16, #tpu.memory_space<vmem>>, vector<8x512xbf16>
    %c0_1 = arith.constant 0 : index
    %c0_2 = arith.constant 0 : index
    %1 = vector.load %arg2[%c0_1, %c0_2] : memref<512x32xbf16, #tpu.memory_space<vmem>>, vector<512x32xbf16>
    %cst = arith.constant dense<0.000000e+00> : vector<8x32xf32>
    %2 = tpu.matmul %0, %1, %cst {dimension_numbers = #tpu.dot_dimension_numbers<[1], [0], [0], [1], [0, 0, 1, 1], [], []>} : vector<8x512xbf16>, vector<512x32xbf16>, vector<8x32xf32> -> vector<8x32xf32>
    %3 = arith.truncf %2 : vector<8x32xf32> to vector<8x32xbf16>
    %c0_3 = arith.constant 0 : index
    %c0_4 = arith.constant 0 : index
    %4 = vector.load %arg3[%c0_3, %c0_4] : memref<8x8xbf16, #tpu.memory_space<vmem>>, vector<8x8xbf16>
    %cst_5 = arith.constant dense<0.000000e+00> : vector<8x32xf32>
    %5 = tpu.matmul %4, %3, %cst_5 {dimension_numbers = #tpu.dot_dimension_numbers<[1], [0], [0], [1], [0, 0, 1, 1], [], []>} : vector<8x8xbf16>, vector<8x32xbf16>, vector<8x32xf32> -> vector<8x32xf32>
    %6 = arith.truncf %5 : vector<8x32xf32> to vector<8x32xbf16>
    %c0_6 = arith.constant 0 : index
    %c0_7 = arith.constant 0 : index
    %7 = vector.load %arg4[%c0_6, %c0_7] : memref<8x8xbf16, #tpu.memory_space<vmem>>, vector<8x8xbf16>
    %cst_8 = arith.constant dense<0.000000e+00> : vector<8x32xf32>
    %8 = tpu.matmul %7, %3, %cst_8 {dimension_numbers = #tpu.dot_dimension_numbers<[1], [0], [0], [1], [0, 0, 1, 1], [], []>} : vector<8x8xbf16>, vector<8x32xbf16>, vector<8x32xf32> -> vector<8x32xf32>
    %9 = arith.truncf %8 : vector<8x32xf32> to vector<8x32xbf16>
    %c0_9 = arith.constant 0 : index
    %c0_10 = arith.constant 0 : index
    %10 = vector.load %arg5[%c0_9, %c0_10] : memref<32x512xbf16, #tpu.memory_space<vmem>>, vector<32x512xbf16>
    %cst_11 = arith.constant dense<0.000000e+00> : vector<8x512xf32>
    %11 = tpu.matmul %6, %10, %cst_11 {dimension_numbers = #tpu.dot_dimension_numbers<[1], [0], [0], [1], [0, 0, 1, 1], [], []>} : vector<8x32xbf16>, vector<32x512xbf16>, vector<8x512xf32> -> vector<8x512xf32>
    %c0_12 = arith.constant 0 : index
    %c0_13 = arith.constant 0 : index
    %12 = vector.load %arg6[%c0_12, %c0_13] : memref<32x512xbf16, #tpu.memory_space<vmem>>, vector<32x512xbf16>
    %cst_14 = arith.constant dense<0.000000e+00> : vector<8x512xf32>
    %13 = tpu.matmul %9, %12, %cst_14 {dimension_numbers = #tpu.dot_dimension_numbers<[1], [0], [0], [1], [0, 0, 1, 1], [], []>} : vector<8x32xbf16>, vector<32x512xbf16>, vector<8x512xf32> -> vector<8x512xf32>
    %14 = arith.addf %11, %13 : vector<8x512xf32>
    %c0_15 = arith.constant 0 : index
    %c0_16 = arith.constant 0 : index
    %15 = vector.load %arg7[%c0_15, %c0_16] : memref<1x512xf32, #tpu.memory_space<vmem>>, vector<1x512xf32>
    %16 = vector.broadcast %15 : vector<1x512xf32> to vector<8x512xf32>
    %17 = arith.addf %14, %16 : vector<8x512xf32>
    %cst_17 = arith.constant 0.000000e+00 : f32
    %18 = vector.broadcast %cst_17 : f32 to vector<8x512xf32>
    %19 = arith.maximumf %17, %18 : vector<8x512xf32>
    %20 = arith.truncf %19 : vector<8x512xf32> to vector<8x512xbf16>
    %c0_18 = arith.constant 0 : index
    %c0_19 = arith.constant 0 : index
    %21 = vector.load %arg8[%c0_18, %c0_19] : memref<512x256xbf16, #tpu.memory_space<vmem>>, vector<512x256xbf16>
    %cst_20 = arith.constant dense<0.000000e+00> : vector<8x256xf32>
    %22 = tpu.matmul %20, %21, %cst_20 {dimension_numbers = #tpu.dot_dimension_numbers<[1], [0], [0], [1], [0, 0, 1, 1], [], []>} : vector<8x512xbf16>, vector<512x256xbf16>, vector<8x256xf32> -> vector<8x256xf32>
    %c0_21 = arith.constant 0 : index
    %c0_22 = arith.constant 0 : index
    %23 = vector.load %arg9[%c0_21, %c0_22] : memref<1x256xf32, #tpu.memory_space<vmem>>, vector<1x256xf32>
    %24 = vector.broadcast %23 : vector<1x256xf32> to vector<8x256xf32>
    %25 = arith.addf %22, %24 : vector<8x256xf32>
    %cst_23 = arith.constant 0.000000e+00 : f32
    %26 = vector.broadcast %cst_23 : f32 to vector<8x256xf32>
    %27 = arith.maximumf %25, %26 : vector<8x256xf32>
    %28 = arith.truncf %27 : vector<8x256xf32> to vector<8x256xbf16>
    %c0_24 = arith.constant 0 : index
    %c0_25 = arith.constant 0 : index
    %29 = vector.load %arg10[%c0_24, %c0_25] : memref<256x128xbf16, #tpu.memory_space<vmem>>, vector<256x128xbf16>
    %cst_26 = arith.constant dense<0.000000e+00> : vector<8x128xf32>
    %30 = tpu.matmul %28, %29, %cst_26 {dimension_numbers = #tpu.dot_dimension_numbers<[1], [0], [0], [1], [0, 0, 1, 1], [], []>} : vector<8x256xbf16>, vector<256x128xbf16>, vector<8x128xf32> -> vector<8x128xf32>
    %c0_27 = arith.constant 0 : index
    %c0_28 = arith.constant 0 : index
    %31 = vector.load %arg11[%c0_27, %c0_28] : memref<1x128xf32, #tpu.memory_space<vmem>>, vector<1x128xf32>
    %32 = vector.broadcast %31 : vector<1x128xf32> to vector<8x128xf32>
    %33 = arith.addf %30, %32 : vector<8x128xf32>
    %c0_29 = arith.constant 0 : index
    %c0_30 = arith.constant 0 : index
    %34 = vector.load %arg12[%c0_29, %c0_30] : memref<8x128xf32, #tpu.memory_space<vmem>>, vector<8x128xf32>
    tpu.vector_store %arg12[%c0_29, %c0_30], %33 {strides = array<i32>} : memref<8x128xf32, #tpu.memory_space<vmem>>, vector<8x128xf32>,
    return
  }
  func.func @transform_0(%arg0: i32) -> (i32, i32) {
    %c0_i32 = arith.constant 0 : i32
    %c0_i32_0 = arith.constant 0 : i32
    %c0_i32_1 = arith.constant 0 : i32
    return %c0_i32, %c0_i32_0 : i32, i32
  }
  func.func @transform_1(%arg0: i32) -> (i32, i32) {
    %c0_i32 = arith.constant 0 : i32
    %c0_i32_0 = arith.constant 0 : i32
    %c0_i32_1 = arith.constant 0 : i32
    return %c0_i32, %c0_i32_0 : i32, i32
  }
  func.func @transform_2(%arg0: i32) -> (i32, i32) {
    %c0_i32 = arith.constant 0 : i32
    %c0_i32_0 = arith.constant 0 : i32
    %c0_i32_1 = arith.constant 0 : i32
    return %c0_i32, %c0_i32_0 : i32, i32
  }
  func.func @transform_3(%arg0: i32) -> (i32, i32) {
    %c0_i32 = arith.constant 0 : i32
    %c0_i32_0 = arith.constant 0 : i32
    %c0_i32_1 = arith.constant 0 : i32
    return %c0_i32, %c0_i32_0 : i32, i32
  }
  func.func @transform_4(%arg0: i32) -> (i32, i32) {
    %c0_i32 = arith.constant 0 : i32
    %c0_i32_0 = arith.constant 0 : i32
    %c0_i32_1 = arith.constant 0 : i32
    return %c0_i32, %c0_i32_0 : i32, i32
  }
  func.func @transform_5(%arg0: i32) -> (i32, i32) {
    %c0_i32 = arith.constant 0 : i32
    %c0_i32_0 = arith.constant 0 : i32
    %c0_i32_1 = arith.constant 0 : i32
    return %c0_i32, %c0_i32_0 : i32, i32
  }
  func.func @transform_6(%arg0: i32) -> (i32, i32) {
    %c0_i32 = arith.constant 0 : i32
    %c0_i32_0 = arith.constant 0 : i32
    %c0_i32_1 = arith.constant 0 : i32
    return %c0_i32, %c0_i32_0 : i32, i32
  }
  func.func @transform_7(%arg0: i32) -> (i32, i32) {
    %c0_i32 = arith.constant 0 : i32
    %c0_i32_0 = arith.constant 0 : i32
    %c0_i32_1 = arith.constant 0 : i32
    return %c0_i32, %c0_i32_0 : i32, i32
  }
  func.func @transform_8(%arg0: i32) -> (i32, i32) {
    %c0_i32 = arith.constant 0 : i32
    %c0_i32_0 = arith.constant 0 : i32
    %c0_i32_1 = arith.constant 0 : i32
    return %c0_i32, %c0_i32_0 : i32, i32
  }
  func.func @transform_9(%arg0: i32) -> (i32, i32) {
    %c0_i32 = arith.constant 0 : i32
    %c0_i32_0 = arith.constant 0 : i32
    %c0_i32_1 = arith.constant 0 : i32
    return %c0_i32, %c0_i32_0 : i32, i32
  }
  func.func @transform_10(%arg0: i32) -> (i32, i32) {
    %c0_i32 = arith.constant 0 : i32
    %c0_i32_0 = arith.constant 0 : i32
    %c0_i32_1 = arith.constant 0 : i32
    return %c0_i32, %c0_i32_0 : i32, i32
  }
  func.func @transform_11(%arg0: i32) -> (i32, i32) {
    %c0_i32 = arith.constant 0 : i32
    %c0_i32_0 = arith.constant 0 : i32
    %c0_i32_1 = arith.constant 0 : i32
    return %c0_i32, %c0_i32_0 : i32, i32
  }
}

</mosaic_0001>

<bundles_post_ra>
// kernel: tpu_custom_call.1
= control target key start
LH: loop header
LB: loop body
LE: loop exit
PB: predicated region body
PF: predicated region fallthrough
CT: control target
= control target key end

     0   :  { %16 = vsyncpa [#allocation3], 0  ;;  %s2257_s0 = inlined_call_operand.vmem [shape: bf16[8,512], index: 0, kind: input, shape index: {}]   ;;  %s2258_s1 = inlined_call_operand.vmem [shape: bf16[512,32], index: 1, kind: input, shape index: {}]   ;;  %s2259_s2 = inlined_call_operand.vmem [shape: bf16[8,8], index: 2, kind: input, shape index: {}]   ;;  %s2260_s3 = inlined_call_operand.vmem [shape: bf16[8,8], index: 3, kind: input, shape index: {}]   ;;  %s2261_s4 = inlined_call_operand.vmem [shape: bf16[32,512], index: 4, kind: input, shape index: {}]   ;;  %s2262_s5 = inlined_call_operand.vmem [shape: bf16[32,512], index: 5, kind: input, shape index: {}]   ;;  %s2263_s6 = inlined_call_operand.vmem [shape: f32[1,512], index: 6, kind: input, shape index: {}]   ;;  %s2264_s7 = inlined_call_operand.hbm [shape: bf16[512,256], index: 7, kind: input, shape index: {}]   ;;  %s2265_s8 = inlined_call_operand.vmem [shape: f32[1,256], index: 8, kind: input, shape index: {}]   ;;  %s2266_s9 = inlined_call_operand.vmem [shape: bf16[256,128], index: 9, kind: input, shape index: {}]   ;;  %s2267_s10 = inlined_call_operand.vmem [shape: f32[1,128], index: 10, kind: input, shape index: {}]   ;;  %s2268_s11 = inlined_call_operand.hbm [shape: f32[8,128], index: 11, kind: output, shape index: {}]  }
   0x1   :  { %17 = vsyncpa [#allocation4], 0  ;;  %s1930_s17 = smov [#allocation2]   ;;  %s1882_s21 = scalar_lea.hbm %s2264_s7, 8192 }
   0x2   :  { %s37_s18 = sshll.u32 %s1930_s17, 4  ;;  %p1883_p0 = scmp.ne.s32.totalorder %s2264_s7, %s1882_s21  ;;  %s38_s18 = int_to_ptr.vmem [resolvable:$true] %s37_s18 }
   0x3   :  { %p1886_p1 = scmp.lt.u32.totalorder %s1882_s21, %s2264_s7 }
   0x5   :  { %p1888_p2 = pnand %p1886_p1, %p1883_p0 }
   0x7   :  { %1891 = shalt.err (!%p1888_p2)
}
   0x8   :  { %s1892_s26 = scalar_lea.vmem %s38_s18, 8192  ;;  %p1897_p4 = scmp.lt.s32.totalorder %s38_s18, %s38_s18 }
   0x9   :  { %p1893_p3 = scmp.ne.s32.totalorder %s38_s18, %s1892_s26  ;;  %p1898_p5 = scmp.lt.s32.totalorder %s1892_s26, %s1892_s26 }
   0xb   :  { %p1899_p6 = por %p1898_p5, %p1897_p4 }
   0xd   :  { %p1900_p7 = pnand %p1899_p6, %p1893_p3 }
   0xf   :  { %1903 = shalt.err (!%p1900_p7)
}
  0x10   :  { %s1931_s27 = smov 128   ;;  %s1932_s28 = smov 8  }
  0x11   :  { %43 = dma.hbm_to_vmem [thread:$0]  %s2264_s7, 8192, %s38_s18, [#allocation3], %s1931_s27, %s1931_s27, %s1932_s28  }
  0x12   :  { %1926 = dma.done.wait [#allocation3], 8192  }
  0x13   :  { %1927 = vsyncadd [#allocation3], 4294959104  ;;  %v1710_v0 = vld [vmem:[%s2258_s1 + $0x40] sm:$0xff]   ;;  %v1712_v2 = vld [vmem:[%s2258_s1 + $0x48] sm:$0xff]   ;;  %v1933_v38 = vmov 0.0   ;;  %vm1934_vm0 = vmmov 0  }
  0x14   :  { %v1711_v1 = vld [vmem:[%s2258_s1] sm:$0xff]   ;;  %1615 = vmatprep.subr.bf16.mxu1 %v1710_v0  ;;  %v1713_v3 = vld [vmem:[%s2258_s1 + $0x8] sm:$0xff]   ;;  %v1714_v4 = vld [vmem:[%s2258_s1 + $0x50] sm:$0xff]   ;;  %vm412_vm1 = vcmask 1043456   ;;  %vm408_vm2 = vcmask 64512   ;;  %v1935_v60 = vmov 0  }
  0x15   :  { %1616 = vmatpush3.bf16.msra.mxu1 %v1711_v1  ;;  %v1715_v5 = vld [vmem:[%s2258_s1 + $0x10] sm:$0xff]   ;;  %v1716_v6 = vld [vmem:[%s2258_s1 + $0x58] sm:$0xff]   ;;  %v1718_v8 = vld [vmem:[%s2258_s1 + $0x60] sm:$0xff]   ;;  %719 = vmatprep.mubr.bf16.mxu0 %v1935_v60  ;;  %vm558_vm3 = vcmask 261120   ;;  %s1936_s14 = smov [#allocation5]  }
  0x16   :  { %1617 = vmatprep.subr.bf16.mxu1 %v1712_v2  ;;  %v1717_v7 = vld [vmem:[%s2258_s1 + $0x18] sm:$0xff]   ;;  %v1719_v9 = vld [vmem:[%s2258_s1 + $0x20] sm:$0xff]   ;;  %v1720_v10 = vld [vmem:[%s2258_s1 + $0x68] sm:$0xff]  }
  0x17   :  { %v54_v11 = vld [vmem:[%s2257_s0] sm:$0xff]  ;;  %v1721_v13 = vld [vmem:[%s2258_s1 + $0x28] sm:$0xff]   ;;  %v1722_v14 = vld [vmem:[%s2258_s1 + $0x70] sm:$0xff]  }
  0x18   :  { %v1477_v12 = vcombine.high %v54_v11, %v54_v11  ;;  %v1723_v15 = vld [vmem:[%s2258_s1 + $0x30] sm:$0xff]   ;;  %v1724_v16 = vld [vmem:[%s2258_s1 + $0x78] sm:$0xff]   ;;  %v1728_v18 = vld [vmem:[%s2258_s1 + $0xc0] sm:$0xff]   ;;  %v1476_v19 = vcombine.low %v54_v11, %v54_v11 }
  0x19   :  { %1618 = vmatpush3.bf16.msra.mxu1 %v1713_v3  ;;  %v1725_v17 = vld [vmem:[%s2258_s1 + $0x38] sm:$0xff]   ;;  %v1729_v20 = vld [vmem:[%s2258_s1 + $0x80] sm:$0xff]   ;;  %v1730_v21 = vld [vmem:[%s2258_s1 + $0xc8] sm:$0xff]  }
  0x1a   :  { %1619 = vmatprep.subr.bf16.mxu1 %v1714_v4  ;;  %358 = vmatprep.mubr.bf16.mxu1 %v1477_v12  ;;  %v55_v22 = vld [vmem:[%s2257_s0 + $0x8] sm:$0xff]  ;;  %v1732_v25 = vld [vmem:[%s2258_s1 + $0xd0] sm:$0xff]   ;;  %v1734_v27 = vld [vmem:[%s2258_s1 + $0xd8] sm:$0xff]  }
  0x1b   :  { %v1731_v23 = vld [vmem:[%s2258_s1 + $0x88] sm:$0xff]   ;;  %v1479_v24 = vcombine.high %v55_v22, %v55_v22  ;;  %v1733_v26 = vld [vmem:[%s2258_s1 + $0x90] sm:$0xff]   ;;  %v1735_v28 = vld [vmem:[%s2258_s1 + $0x98] sm:$0xff]   ;;  %v1478_v37 = vcombine.low %v55_v22, %v55_v22 }
  0x1c   :  { %v1736_v29 = vld [vmem:[%s2258_s1 + $0xe0] sm:$0xff]   ;;  %v1738_v31 = vld [vmem:[%s2258_s1 + $0xe8] sm:$0xff]   ;;  %v1740_v33 = vld [vmem:[%s2258_s1 + $0xf0] sm:$0xff]  }
  0x1d   :  { %1620 = vmatpush3.bf16.msra.mxu1 %v1715_v5  ;;  %v1737_v30 = vld [vmem:[%s2258_s1 + $0xa0] sm:$0xff]   ;;  %v1739_v32 = vld [vmem:[%s2258_s1 + $0xa8] sm:$0xff]   ;;  %v1741_v34 = vld [vmem:[%s2258_s1 + $0xb0] sm:$0xff]  }
  0x1e   :  { %1621 = vmatprep.subr.bf16.mxu1 %v1716_v6  ;;  %v1742_v35 = vld [vmem:[%s2258_s1 + $0xf8] sm:$0xff]   ;;  %v1746_v39 = vld [vmem:[%s2261_s4 + $0x4] ss:$16 sps:$4 sm:$0xff]   ;;  %v1748_v40 = vld [vmem:[%s2261_s4] ss:$16 sps:$4 sm:$0xff]  }
  0x1f   :  { %v1743_v36 = vld [vmem:[%s2258_s1 + $0xb8] sm:$0xff]   ;;  %v1749_v41 = vld [vmem:[%s2261_s4 + $0x24] ss:$16 sps:$4 sm:$0xff]   ;;  %687 = vmatprep.subr.bf16.mxu0 %v1746_v39  ;;  %v407_v55 = vld [vmem:[%s2259_s2] sm:$0xf] }
  0x20   :  { %688 = vmatpush1.bf16.msra.mxu0 %v1748_v40  ;;  %v457_v56 = vld [vmem:[%s2260_s3] sm:$0xf]  ;;  %v1754_v59 = vld [vmem:[%s2262_s5 + $0x4] ss:$16 sps:$4 sm:$0xff]   ;;  %v1760_v63 = vld [vmem:[%s2262_s5 + $0xc] ss:$16 sps:$4 sm:$0xff]  }
  0x21   :  { %1622 = vmatpush3.bf16.msra.mxu1 %v1717_v7  ;;  %689 = vmatprep.subr.bf16.mxu0 %v1749_v41  ;;  %v1751_v57 = vld [vmem:[%s2261_s4 + $0x20] ss:$16 sps:$4 sm:$0xff]   ;;  %v1757_v61 = vld [vmem:[%s2262_s5 + $0x24] ss:$16 sps:$4 sm:$0xff]   ;;  %v1758_v11 = vld [vmem:[%s2262_s5 + $0x8] ss:$16 sps:$4 sm:$0xff]  }
  0x22   :  { %1623 = vmatprep.subr.bf16.mxu1 %v1718_v8  ;;  %v1752_v58 = vld [vmem:[%s2262_s5] ss:$16 sps:$4 sm:$0xff]   ;;  %v1772_v0 = vld [vmem:[#allocation2 + $0x4] ss:$8 sps:$4 sm:$0xff]   ;;  %v1775_v5 = vld [vmem:[#allocation2 + $0x14] ss:$8 sps:$4 sm:$0xff]  }
  0x23   :  { %v1755_v62 = vld [vmem:[%s2262_s5 + $0x20] ss:$16 sps:$4 sm:$0xff]   ;;  %v1784_v22 = vld [vmem:[#allocation2 + $0x44] ss:$8 sps:$4 sm:$0xff]   ;;  %v1805_v39 = vld [vmem:[#allocation2 + $0xb4] ss:$8 sps:$4 sm:$0xff]  }
  0x24   :  { %690 = vmatpush1.bf16.msra.mxu0 %v1751_v57  ;;  %v1770_v2 = vld [vmem:[#allocation2] ss:$8 sps:$4 sm:$0xff]   ;;  %v1773_v8 = vld [vmem:[#allocation2 + $0x10] ss:$8 sps:$4 sm:$0xff]  }
  0x25   :  { %1624 = vmatpush3.bf16.msra.mxu1 %v1719_v9  ;;  %1199 = vmatprep.subr.bf16.mxu0 %v1772_v0  ;;  %v1778_v9 = vld [vmem:[#allocation2 + $0x24] ss:$8 sps:$4 sm:$0xff]   ;;  %v1803_v40 = vld [vmem:[#allocation2 + $0xb0] ss:$8 sps:$4 sm:$0xff]   ;;  %v1806_v41 = vld [vmem:[#allocation2 + $0xc0] ss:$8 sps:$4 sm:$0xff]  }
  0x26   :  { %1625 = vmatprep.subr.bf16.mxu1 %v1720_v10  ;;  %v1868_v57 = vld [vmem:[%s2266_s9 + $0x48] sm:$0xff]   ;;  %v1875_v0 = vld [vmem:[%s2266_s9 + $0x20] sm:$0xff]  }
  0x29   :  { %1626 = vmatpush3.bf16.msra.mxu1 %v1721_v13 }
  0x2a   :  { %1627 = vmatprep.subr.bf16.mxu1 %v1722_v14  ;;  %v1763_v14 = vld [vmem:[%s2262_s5 + $0x2c] ss:$16 sps:$4 sm:$0xff]  }
  0x2d   :  { %1628 = vmatpush3.bf16.msra.mxu1 %v1723_v15  ;;  %v1776_v15 = vld [vmem:[#allocation2 + $0x20] ss:$8 sps:$4 sm:$0xff]  }
  0x2e   :  { %1629 = vmatprep.subr.bf16.mxu1 %v1724_v16 }
  0x31   :  { %1630 = vmatpush3.bf16.msra.mxu1 %v1725_v17  ;;  %v1781_v17 = vld [vmem:[#allocation2 + $0x34] ss:$8 sps:$4 sm:$0xff]  }
  0x32   :  { %1637 = vmatprep.subr.bf16.mxu1 %v1728_v18 }
  0x34   :  { %359 = vmatmul.mubr.bf16.vlgmr.msra.gmra.mrb[0].mxu1 %v1476_v19  ;;  %v1761_v19 = vld [vmem:[%s2262_s5 + $0x28] ss:$16 sps:$4 sm:$0xff]  }
  0x35   :  { %1638 = vmatpush3.bf16.msra.mxu1 %v1729_v20  ;;  %398 = vmatprep.mubr.bf16.mxu1 %v1479_v24  ;;  %v1766_v20 = vld [vmem:[%s2261_s4 + $0xc] ss:$16 sps:$4 sm:$0xff]  }
  0x36   :  { %1639 = vmatprep.subr.bf16.mxu1 %v1730_v21  ;;  %v1779_v21 = vld [vmem:[#allocation2 + $0x30] ss:$8 sps:$4 sm:$0xff]   ;;  %v1769_v24 = vld [vmem:[%s2261_s4 + $0x2c] ss:$16 sps:$4 sm:$0xff]  }
  0x39   :  { %1640 = vmatpush3.bf16.msra.mxu1 %v1731_v23  ;;  %v1764_v23 = vld [vmem:[%s2261_s4 + $0x8] ss:$16 sps:$4 sm:$0xff]  }
  0x3a   :  { %1641 = vmatprep.subr.bf16.mxu1 %v1732_v25  ;;  %v1782_v25 = vld [vmem:[#allocation2 + $0x40] ss:$8 sps:$4 sm:$0xff]  }
  0x3d   :  { %1642 = vmatpush3.bf16.msra.mxu1 %v1733_v26  ;;  %v1787_v26 = vld [vmem:[#allocation2 + $0x54] ss:$8 sps:$4 sm:$0xff]  }
  0x3e   :  { %1643 = vmatprep.subr.bf16.mxu1 %v1734_v27  ;;  %v1767_v27 = vld [vmem:[%s2261_s4 + $0x28] ss:$16 sps:$4 sm:$0xff]  }
  0x41   :  { %1644 = vmatpush3.bf16.msra.mxu1 %v1735_v28  ;;  %v1785_v28 = vld [vmem:[#allocation2 + $0x50] ss:$8 sps:$4 sm:$0xff]  }
  0x42   :  { %1645 = vmatprep.subr.bf16.mxu1 %v1736_v29  ;;  %v1790_v29 = vld [vmem:[#allocation2 + $0x64] ss:$8 sps:$4 sm:$0xff]  }
  0x45   :  { %1646 = vmatpush3.bf16.msra.mxu1 %v1737_v30  ;;  %v1788_v30 = vld [vmem:[#allocation2 + $0x60] ss:$8 sps:$4 sm:$0xff]  }
  0x46   :  { %1647 = vmatprep.subr.bf16.mxu1 %v1738_v31  ;;  %v1793_v31 = vld [vmem:[#allocation2 + $0x74] ss:$8 sps:$4 sm:$0xff]  }
  0x49   :  { %1648 = vmatpush3.bf16.msra.mxu1 %v1739_v32  ;;  %v1791_v32 = vld [vmem:[#allocation2 + $0x70] ss:$8 sps:$4 sm:$0xff]  }
  0x4a   :  { %1649 = vmatprep.subr.bf16.mxu1 %v1740_v33  ;;  %v1796_v33 = vld [vmem:[#allocation2 + $0x84] ss:$8 sps:$4 sm:$0xff]  }
  0x4d   :  { %1650 = vmatpush3.bf16.msra.mxu1 %v1741_v34  ;;  %v1794_v34 = vld [vmem:[#allocation2 + $0x80] ss:$8 sps:$4 sm:$0xff]  }
  0x4e   :  { %1651 = vmatprep.subr.bf16.mxu1 %v1742_v35  ;;  %v1799_v35 = vld [vmem:[#allocation2 + $0x94] ss:$8 sps:$4 sm:$0xff]  }
  0x51   :  { %1652 = vmatpush3.bf16.msra.mxu1 %v1743_v36  ;;  %v1797_v36 = vld [vmem:[#allocation2 + $0x90] ss:$8 sps:$4 sm:$0xff]  }
  0x52   :  { %1685 = vmatprep.subr.bf16.mxu1 %v1933_v38 }
  0x54   :  { %399 = vmatmul.mubr.bf16.vlgmr.msra.gmra.mrb[4].mxu1 %v1478_v37  ;;  %v1802_v37 = vld [vmem:[#allocation2 + $0xa4] ss:$8 sps:$4 sm:$0xff]  }
  0x55   :  { %1687 = vmatprep.mubr.msk.bf16.mxu1 %vm1934_vm0, %v1933_v38 }
 0x107   :  { %v1631_v42 = vpop.f32.mrb[0].mxu1 }
 0x108   :  { %v1632_v43 = vpop.f32.mrb[1].mxu1 }
 0x109   :  { %v1633_v44 = vadd.f32 %v1632_v43, %v1631_v42  ;;  %v1634_v45 = vpop.f32.mrb[2].mxu1  ;;  %v1808_v42 = vld [vmem:[#allocation2 + $0xc4] ss:$8 sps:$4 sm:$0xff]   ;;  %v1809_v43 = vld [vmem:[#allocation2 + $0xd0] ss:$8 sps:$4 sm:$0xff]  }
 0x10a   :  { %v1635_v46 = vpop.f32.mrb[3].mxu1  ;;  %v1814_v45 = vld [vmem:[#allocation2 + $0xe4] ss:$8 sps:$4 sm:$0xff]  }
 0x10b   :  { %v1812_v46 = vld [vmem:[#allocation2 + $0xe0] ss:$8 sps:$4 sm:$0xff]  }
 0x127   :  { %v1653_v47 = vpop.f32.mrb[4].mxu1 }
 0x128   :  { %v1654_v48 = vpop.f32.mrb[5].mxu1 }
 0x129   :  { %v1655_v49 = vadd.f32 %v1654_v48, %v1653_v47  ;;  %v1656_v50 = vpop.f32.mrb[6].mxu1  ;;  %v1817_v47 = vld [vmem:[#allocation2 + $0xf4] ss:$8 sps:$4 sm:$0xff]   ;;  %v1815_v48 = vld [vmem:[#allocation2 + $0xf0] ss:$8 sps:$4 sm:$0xff]  }
 0x12a   :  { %v1657_v51 = vpop.f32.mrb[7].mxu1  ;;  %v771_v50 = vlaneseq }
 0x12b   :  { %v401_v52 = vadd.f32 %v1655_v49, %v1633_v44  ;;  %v1811_v44 = vld [vmem:[#allocation2 + $0xd4] ss:$8 sps:$4 sm:$0xff]   ;;  %v1820_v49 = vld [vmem:[#allocation2 + $0x104] ss:$8 sps:$4 sm:$0xff]  }
 0x12c   :  { %v2171_v51 = vshrl.u32 %v771_v50, 7  ;;  %v1838_v50 = vld [vmem:[#allocation2 + $0x164] ss:$8 sps:$4 sm:$0xff]  }
 0x12d   :  { %v406_v53 = vpack.c.bf16 %v401_v52, %v401_v52 }
 0x12e   :  { %v781_v52 = vsub.s32 2, %v2171_v51 }
 0x12f   :  { %v414_v54 = vsel %vm412_vm1, %v406_v53, 0  ;;  %v769_v53 = vld [vmem:[%s2263_s6] sm:$0xf]  ;;  %s1467_s6 = sshll.u32 %s1936_s14, 4  ;;  %s1468_s6 = int_to_ptr.vmem [resolvable:$true] %s1467_s6 }
 0x130   :  { %1686 = vmatpush3.bf16.msra.mxu1 %v414_v54  ;;  %s1904_s15 = scalar_lea.vmem %s1468_s6, 128  ;;  %p1909_p9 = scmp.lt.s32.totalorder %s1468_s6, %s1468_s6 }
 0x131   :  { %1691 = vmatprep.subr.bf16.mxu1 %v1933_v38  ;;  %p1905_p8 = scmp.ne.s32.totalorder %s1468_s6, %s1904_s15  ;;  %p1910_p10 = scmp.lt.s32.totalorder %s1904_s15, %s1904_s15 }
 0x133   :  { %1688 = vmatmul.mubr.msk.bf16.vlgmr.msra.gmra.mrb[8].mxu1 %vm408_vm2, %v407_v55  ;;  %v1866_v55 = vld [vmem:[%s2266_s9 + $0x40] sm:$0xff]   ;;  %p1911_p11 = por %p1910_p10, %p1909_p9 }
 0x134   :  { %1692 = vmatpush3.bf16.msra.mxu1 %v414_v54  ;;  %1693 = vmatprep.mubr.msk.bf16.mxu1 %vm1934_vm0, %v1933_v38  ;;  %v1800_v38 = vld [vmem:[#allocation2 + $0xa0] ss:$8 sps:$4 sm:$0xff]   ;;  %v2177_v54 = vrot.slane %v769_v53, %v781_v52 }
 0x135   :  { %562 = vmatprep.subr.bf16.mxu1 %v1754_v59  ;;  %v1870_v59 = vld [vmem:[%s2266_s9 + $0x50] sm:$0xff]   ;;  %v1836_v52 = vld [vmem:[#allocation2 + $0x160] ss:$8 sps:$4 sm:$0xff]   ;;  %p1912_p12 = pnand %p1911_p11, %p1905_p8 }
 0x13b   :  { %1694 = vmatmul.mubr.msk.bf16.vlgmr.msra.gmra.mrb[12].mxu1 %vm408_vm2, %v457_v56  ;;  %v1867_v56 = vld [vmem:[%s2266_s9] sm:$0xff]  }
 0x13c   :  { %594 = vmatprep.mubr.bf16.mxu1 %v1935_v60  ;;  %563 = vmatpush1.bf16.msra.mxu1 %v1752_v58  ;;  %v1869_v58 = vld [vmem:[%s2266_s9 + $0x8] sm:$0xff]  }
 0x13d   :  { %564 = vmatprep.subr.bf16.mxu1 %v1757_v61  ;;  %v1872_v61 = vld [vmem:[%s2266_s9 + $0x58] sm:$0xff]  }
 0x140   :  { %565 = vmatpush1.bf16.msra.mxu1 %v1755_v62  ;;  %v1873_v62 = vld [vmem:[%s2266_s9 + $0x18] sm:$0xff]  }
 0x141   :  { %603 = vmatprep.subr.bf16.mxu1 %v1760_v63  ;;  %v1874_v63 = vld [vmem:[%s2266_s9 + $0x60] sm:$0xff]  }
 0x206   :  { %v450_v1 = vpop.f32.mrb[8].mxu1 }
 0x207   :  { %v456_v3 = vpack.c.bf16 %v450_v1, %v450_v1  ;;  %v1689_v4 = vpop.f32.mrb[9].mxu1  ;;  %v1876_v1 = vld [vmem:[%s2266_s9 + $0x68] sm:$0xff]  }
 0x208   :  { %v453_v6 = vpop.f32.mrb[10].mxu1 }
 0x209   :  { %v1690_v7 = vpop.f32.mrb[11].mxu1  ;;  %1532 = vmatmul.mubr.msk.bf16.vlgmr.msra.gmra.mrb[0].mxu0 %vm558_vm3, %v456_v3 }
 0x20a   :  { %1200 = vmatpush1.bf16.msra.mxu0 %v1770_v2  ;;  %v1877_v2 = vld [vmem:[%s2266_s9 + $0x28] sm:$0xff]   ;;  %v773_v7 = vsub.s32 0, %v2171_v51 }
 0x20b   :  { %1201 = vmatprep.subr.bf16.mxu0 %v1775_v5 }
 0x20e   :  { %v495_v10 = vpop.f32.mrb[12].mxu1  ;;  %1202 = vmatpush1.bf16.msra.mxu0 %v1773_v8  ;;  %v777_v8 = vsub.s32 1, %v2171_v51 }
 0x20f   :  { %v501_v12 = vpack.c.bf16 %v495_v10, %v495_v10  ;;  %v1695_v13 = vpop.f32.mrb[13].mxu1  ;;  %1203 = vmatprep.subr.bf16.mxu0 %v1778_v9  ;;  %v774_v9 = vrot.slane %v769_v53, %v773_v7 }
 0x210   :  { %v498_v16 = vpop.f32.mrb[14].mxu1 }
 0x211   :  { %1522 = vmatmul.mubr.msk.bf16.vlgmr.msra.gmra.mrb[16].mxu1 %vm558_vm3, %v501_v12  ;;  %v1696_v18 = vpop.f32.mrb[15].mxu1 }
 0x212   :  { %604 = vmatpush1.bf16.msra.mxu1 %v1758_v11  ;;  %635 = vmatprep.mubr.bf16.mxu1 %v1935_v60  ;;  %v778_v11 = vrot.slane %v769_v53, %v777_v8 }
 0x213   :  { %605 = vmatprep.subr.bf16.mxu1 %v1763_v14  ;;  %1204 = vmatpush1.bf16.msra.mxu0 %v1776_v15 }
 0x214   :  { %1205 = vmatprep.subr.bf16.mxu0 %v1781_v17 }
 0x216   :  { %606 = vmatpush1.bf16.msra.mxu1 %v1761_v19 }
 0x217   :  { %728 = vmatprep.subr.bf16.mxu1 %v1766_v20  ;;  %1206 = vmatpush1.bf16.msra.mxu0 %v1779_v21 }
 0x218   :  { %1207 = vmatprep.subr.bf16.mxu0 %v1784_v22 }
 0x219   :  { %1523 = vmatmul.mubr.msk.bf16.vlgmr.msra.gmra.mrb[20].mxu1 %vm558_vm3, %v501_v12 }
 0x21a   :  { %729 = vmatpush1.bf16.msra.mxu1 %v1764_v23  ;;  %760 = vmatprep.mubr.bf16.mxu1 %v1935_v60  ;;  %v1871_v60 = vld [vmem:[%s2266_s9 + $0x10] sm:$0xff]   ;;  %v1818_v23 = vld [vmem:[#allocation2 + $0x100] ss:$8 sps:$4 sm:$0xff]  }
 0x21b   :  { %730 = vmatprep.subr.bf16.mxu1 %v1769_v24  ;;  %1208 = vmatpush1.bf16.msra.mxu0 %v1782_v25 }
 0x21c   :  { %1209 = vmatprep.subr.bf16.mxu0 %v1787_v26  ;;  %v1823_v26 = vld [vmem:[#allocation2 + $0x114] ss:$8 sps:$4 sm:$0xff]  }
 0x21e   :  { %731 = vmatpush1.bf16.msra.mxu1 %v1767_v27 }
 0x21f   :  { %1210 = vmatpush1.bf16.msra.mxu0 %v1785_v28  ;;  %1663 = vmatprep.subr.bf16.mxu1 %v1866_v55  ;;  %v1844_v55 = vld [vmem:[#allocation2 + $0x184] ss:$8 sps:$4 sm:$0xff]  }
 0x220   :  { %1211 = vmatprep.subr.bf16.mxu0 %v1790_v29  ;;  %v1821_v29 = vld [vmem:[#allocation2 + $0x110] ss:$8 sps:$4 sm:$0xff]  }
 0x221   :  { %1533 = vmatmul.mubr.msk.bf16.vlgmr.msra.gmra.mrb[24].mxu1 %vm558_vm3, %v456_v3 }
 0x222   :  { %1664 = vmatpush3.bf16.msra.mxu1 %v1867_v56  ;;  %v1842_v56 = vld [vmem:[#allocation2 + $0x180] ss:$8 sps:$4 sm:$0xff]  }
 0x223   :  { %1212 = vmatpush1.bf16.msra.mxu0 %v1788_v30  ;;  %1665 = vmatprep.subr.bf16.mxu1 %v1868_v57  ;;  %v785_v30 = vsub.s32 3, %v2171_v51  ;;  %v1847_v57 = vld [vmem:[#allocation2 + $0x194] ss:$8 sps:$4 sm:$0xff]  }
 0x224   :  { %1213 = vmatprep.subr.bf16.mxu0 %v1793_v31  ;;  %v1826_v31 = vld [vmem:[#allocation2 + $0x124] ss:$8 sps:$4 sm:$0xff]  }
 0x226   :  { %1666 = vmatpush3.bf16.msra.mxu1 %v1869_v58  ;;  %v1845_v58 = vld [vmem:[#allocation2 + $0x190] ss:$8 sps:$4 sm:$0xff]  }
 0x227   :  { %1214 = vmatpush1.bf16.msra.mxu0 %v1791_v32  ;;  %1667 = vmatprep.subr.bf16.mxu1 %v1870_v59  ;;  %v1850_v59 = vld [vmem:[#allocation2 + $0x1a4] ss:$8 sps:$4 sm:$0xff]  }
 0x228   :  { %1215 = vmatprep.subr.bf16.mxu0 %v1796_v33  ;;  %v786_v33 = vrot.slane %v769_v53, %v785_v30  ;;  %v1841_v53 = vld [vmem:[#allocation2 + $0x174] ss:$8 sps:$4 sm:$0xff]  }
 0x22a   :  { %1668 = vmatpush3.bf16.msra.mxu1 %v1871_v60  ;;  %v1848_v60 = vld [vmem:[#allocation2 + $0x1a0] ss:$8 sps:$4 sm:$0xff]  }
 0x22b   :  { %1216 = vmatpush1.bf16.msra.mxu0 %v1794_v34  ;;  %1669 = vmatprep.subr.bf16.mxu1 %v1872_v61  ;;  %v1824_v34 = vld [vmem:[#allocation2 + $0x120] ss:$8 sps:$4 sm:$0xff]   ;;  %v1853_v61 = vld [vmem:[#allocation2 + $0x1b4] ss:$8 sps:$4 sm:$0xff]  }
 0x22c   :  { %1217 = vmatprep.subr.bf16.mxu0 %v1799_v35 }
 0x22e   :  { %1670 = vmatpush3.bf16.msra.mxu1 %v1873_v62  ;;  %v1851_v62 = vld [vmem:[#allocation2 + $0x1b0] ss:$8 sps:$4 sm:$0xff]  }
 0x22f   :  { %1218 = vmatpush1.bf16.msra.mxu0 %v1797_v36  ;;  %1671 = vmatprep.subr.bf16.mxu1 %v1874_v63  ;;  %v1856_v63 = vld [vmem:[#allocation2 + $0x1c4] ss:$8 sps:$4 sm:$0xff]  }
 0x230   :  { %1219 = vmatprep.subr.bf16.mxu0 %v1802_v37  ;;  %v1829_v37 = vld [vmem:[#allocation2 + $0x134] ss:$8 sps:$4 sm:$0xff]  }
 0x232   :  { %1672 = vmatpush3.bf16.msra.mxu1 %v1875_v0  ;;  %v1854_v0 = vld [vmem:[#allocation2 + $0x1c0] ss:$8 sps:$4 sm:$0xff]  }
 0x233   :  { %1220 = vmatpush1.bf16.msra.mxu0 %v1800_v38  ;;  %1673 = vmatprep.subr.bf16.mxu1 %v1876_v1  ;;  %v1859_v1 = vld [vmem:[#allocation2 + $0x1d4] ss:$8 sps:$4 sm:$0xff]  }
 0x234   :  { %1221 = vmatprep.subr.bf16.mxu0 %v1805_v39 }
 0x236   :  { %1674 = vmatpush3.bf16.msra.mxu1 %v1877_v2  ;;  %v1857_v2 = vld [vmem:[#allocation2 + $0x1d0] ss:$8 sps:$4 sm:$0xff]  }
 0x237   :  { %1222 = vmatpush1.bf16.msra.mxu0 %v1803_v40 }
 0x238   :  { %1223 = vmatprep.subr.bf16.mxu0 %v1808_v42 }
 0x23b   :  { %1224 = vmatpush1.bf16.msra.mxu0 %v1806_v41 }
 0x23c   :  { %1225 = vmatprep.subr.bf16.mxu0 %v1811_v44  ;;  %v1832_v44 = vld [vmem:[#allocation2 + $0x144] ss:$8 sps:$4 sm:$0xff]  }
 0x23f   :  { %1226 = vmatpush1.bf16.msra.mxu0 %v1809_v43  ;;  %v1827_v43 = vld [vmem:[#allocation2 + $0x130] ss:$8 sps:$4 sm:$0xff]  }
 0x240   :  { %1227 = vmatprep.subr.bf16.mxu0 %v1814_v45 }
 0x243   :  { %1228 = vmatpush1.bf16.msra.mxu0 %v1812_v46 }
 0x244   :  { %1229 = vmatprep.subr.bf16.mxu0 %v1817_v47  ;;  %v1830_v47 = vld [vmem:[#allocation2 + $0x140] ss:$8 sps:$4 sm:$0xff]  }
 0x247   :  { %1230 = vmatpush1.bf16.msra.mxu0 %v1815_v48  ;;  %v1835_v48 = vld [vmem:[#allocation2 + $0x154] ss:$8 sps:$4 sm:$0xff]  }
 0x248   :  { %1240 = vmatprep.subr.bf16.mxu0 %v1820_v49  ;;  %v1833_v49 = vld [vmem:[#allocation2 + $0x150] ss:$8 sps:$4 sm:$0xff]  }
 0x2dc   :  { %v721_v3 = vpop.f32.mrb[0].mxu0 }
 0x2dd   :  { %v723_v4 = vpop.f32.mrb[1].mxu0 }
 0x2de   :  { %v725_v5 = vpop.f32.mrb[2].mxu0 }
 0x2df   :  { %v726_v6 = vpop.f32.mrb[3].mxu0  ;;  %v1865_v5 = vld [vmem:[#allocation2 + $0x1f4] ss:$8 sps:$4 sm:$0xff]  }
 0x2e0   :  { %v1863_v6 = vld [vmem:[#allocation2 + $0x1f0] ss:$8 sps:$4 sm:$0xff]  }
 0x2e4   :  { %v596_v10 = vpop.f32.mrb[16].mxu1 }
 0x2e5   :  { %v722_v12 = vadd.f32 %v721_v3, %v596_v10  ;;  %v598_v13 = vpop.f32.mrb[17].mxu1  ;;  %v1862_v3 = vld [vmem:[#allocation2 + $0x1e4] ss:$8 sps:$4 sm:$0xff]  }
 0x2e6   :  { %v724_v14 = vadd.f32 %v723_v4, %v598_v13  ;;  %v600_v15 = vpop.f32.mrb[18].mxu1  ;;  %v1860_v4 = vld [vmem:[#allocation2 + $0x1e0] ss:$8 sps:$4 sm:$0xff]   ;;  %v1880_v13 = vld [vmem:[%s2266_s9 + $0x78] sm:$0xff]  }
 0x2e7   :  { %v791_v16 = vadd.f32 %v774_v9, %v722_v12  ;;  %v601_v17 = vpop.f32.mrb[19].mxu1  ;;  %v1879_v12 = vld [vmem:[%s2266_s9 + $0x30] sm:$0xff]   ;;  %v867_v15 = vld [vmem:[%s2265_s8] sm:$0x3] }
 0x2e8   :  { %v792_v18 = vadd.f32 %v778_v11, %v724_v14  ;;  %v1878_v11 = vld [vmem:[%s2266_s9 + $0x70] sm:$0xff]   ;;  %v1881_v14 = vld [vmem:[%s2266_s9 + $0x38] sm:$0xff]   ;;  %v876_v17 = vrot.slane %v867_v15, %v777_v8 }
 0x2e9   :  { %v795_v19 = vmax.f32 %v791_v16, 0.0  ;;  %1675 = vmatprep.subr.bf16.mxu1 %v1878_v11  ;;  %v872_v16 = vrot.slane %v867_v15, %v773_v7  ;;  %v1598_v7 = vld [vmem:[%s2267_s10] ss:$0 sm:$0xff] }
 0x2ea   :  { %v796_v20 = vmax.f32 %v792_v18, 0.0  ;;  %1676 = vmatpush3.bf16.msra.mxu1 %v1879_v12 }
 0x2eb   :  { %v799_v24 = vpack.c.bf16 %v795_v19, %v795_v19  ;;  %1677 = vmatprep.subr.bf16.mxu1 %v1880_v13 }
 0x2ec   :  { %v800_v21 = vpack.c.bf16 %v796_v20, %v796_v20  ;;  %v637_v22 = vpop.f32.mrb[20].mxu1 }
 0x2ed   :  { %v639_v25 = vpop.f32.mrb[21].mxu1 }
 0x2ee   :  { %v641_v27 = vpop.f32.mrb[22].mxu1  ;;  %1231 = vmatprep.mubr.bf16.mxu0 %v800_v21  ;;  %1678 = vmatpush3.bf16.msra.mxu1 %v1881_v14 }
 0x2ef   :  { %v642_v28 = vpop.f32.mrb[23].mxu1  ;;  %1232 = vmatmul.mubr.bf16.vlgmr.msra.gmra.mrb[4].mxu0 %v799_v24 }
 0x2f0   :  { %1241 = vmatpush1.bf16.msra.mxu0 %v1818_v23 }
 0x2f1   :  { %1242 = vmatprep.subr.bf16.mxu0 %v1823_v26 }
 0x2f4   :  { %1243 = vmatpush1.bf16.msra.mxu0 %v1821_v29  ;;  %v762_v32 = vpop.f32.mrb[24].mxu1 }
 0x2f5   :  { %v763_v35 = vadd.f32 %v762_v32, %v637_v22  ;;  %v764_v36 = vpop.f32.mrb[25].mxu1  ;;  %1244 = vmatprep.subr.bf16.mxu0 %v1826_v31 }
 0x2f6   :  { %v765_v38 = vadd.f32 %v764_v36, %v639_v25  ;;  %v766_v39 = vpop.f32.mrb[26].mxu1 }
 0x2f7   :  { %v793_v40 = vadd.f32 %v2177_v54, %v763_v35  ;;  %v767_v41 = vpop.f32.mrb[27].mxu1  ;;  %v1839_v54 = vld [vmem:[#allocation2 + $0x170] ss:$8 sps:$4 sm:$0xff]  }
 0x2f8   :  { %v794_v42 = vadd.f32 %v786_v33, %v765_v38  ;;  %1245 = vmatpush1.bf16.msra.mxu0 %v1824_v34 }
 0x2f9   :  { %1246 = vmatprep.subr.bf16.mxu0 %v1829_v37  ;;  %v797_v9 = vmax.f32 %v793_v40, 0.0 }
 0x2fa   :  { %v798_v45 = vmax.f32 %v794_v42, 0.0 }
 0x2fb   :  { %v801_v10 = vpack.c.bf16 %v797_v9, %v797_v9 }
 0x2fc   :  { %v802_v46 = vpack.c.bf16 %v798_v45, %v798_v45  ;;  %1247 = vmatpush1.bf16.msra.mxu0 %v1827_v43 }
 0x2fd   :  { %1248 = vmatprep.subr.bf16.mxu0 %v1832_v44 }
 0x2fe   :  { %1272 = vmatprep.mubr.bf16.mxu0 %v802_v46 }
 0x300   :  { %1249 = vmatpush1.bf16.msra.mxu0 %v1830_v47 }
 0x301   :  { %1250 = vmatprep.subr.bf16.mxu0 %v1835_v48 }
 0x304   :  { %1251 = vmatpush1.bf16.msra.mxu0 %v1833_v49 }
 0x305   :  { %1252 = vmatprep.subr.bf16.mxu0 %v1838_v50 }
 0x308   :  { %1253 = vmatpush1.bf16.msra.mxu0 %v1836_v52 }
 0x309   :  { %1254 = vmatprep.subr.bf16.mxu0 %v1841_v53 }
 0x30c   :  { %1255 = vmatpush1.bf16.msra.mxu0 %v1839_v54 }
 0x30d   :  { %1256 = vmatprep.subr.bf16.mxu0 %v1844_v55 }
 0x310   :  { %1257 = vmatpush1.bf16.msra.mxu0 %v1842_v56 }
 0x311   :  { %1258 = vmatprep.subr.bf16.mxu0 %v1847_v57 }
 0x314   :  { %1259 = vmatpush1.bf16.msra.mxu0 %v1845_v58 }
 0x315   :  { %1260 = vmatprep.subr.bf16.mxu0 %v1850_v59 }
 0x318   :  { %1261 = vmatpush1.bf16.msra.mxu0 %v1848_v60 }
 0x319   :  { %1262 = vmatprep.subr.bf16.mxu0 %v1853_v61 }
 0x31c   :  { %1263 = vmatpush1.bf16.msra.mxu0 %v1851_v62 }
 0x31d   :  { %1264 = vmatprep.subr.bf16.mxu0 %v1856_v63 }
 0x320   :  { %1265 = vmatpush1.bf16.msra.mxu0 %v1854_v0 }
 0x321   :  { %1266 = vmatprep.subr.bf16.mxu0 %v1859_v1 }
 0x324   :  { %1267 = vmatpush1.bf16.msra.mxu0 %v1857_v2 }
 0x325   :  { %1268 = vmatprep.subr.bf16.mxu0 %v1862_v3 }
 0x328   :  { %1269 = vmatpush1.bf16.msra.mxu0 %v1860_v4 }
 0x329   :  { %1270 = vmatprep.subr.bf16.mxu0 %v1865_v5 }
 0x32c   :  { %1271 = vmatpush1.bf16.msra.mxu0 %v1863_v6 }
 0x32f   :  { %1273 = vmatmul.mubr.bf16.vlgmr.msra.gmra.mrb[4].mxu0 %v801_v10 }
 0x402   :  { %v1274_v18 = vpop.f32.mrb[4].mxu0 }
 0x403   :  { %v1697_v19 = vadd.f32 %v1274_v18, %v872_v16  ;;  %v1276_v20 = vpop.f32.mrb[5].mxu0 }
 0x404   :  { %v1698_v21 = vadd.f32 %v1276_v20, %v876_v17  ;;  %v1278_v22 = vpop.f32.mrb[6].mxu0 }
 0x405   :  { %v1281_v23 = vmax.f32 %v1697_v19, 0.0  ;;  %v1279_v24 = vpop.f32.mrb[7].mxu0 }
 0x406   :  { %v1282_v25 = vmax.f32 %v1698_v21, 0.0 }
 0x407   :  { %v1283_v27 = vpack.c.bf16 %v1281_v23, %v1281_v23 }
 0x408   :  { %v1284_v26 = vpack.c.bf16 %v1282_v25, %v1282_v25 }
 0x40a   :  { %1452 = vmatprep.mubr.bf16.mxu1 %v1284_v26 }
 0x40b   :  { %1453 = vmatmul.mubr.bf16.vlgmr.msra.gmra.mrb[28].mxu1 %v1283_v27 }
 0x4de   :  { %v1679_v28 = vpop.f32.mrb[28].mxu1 }
 0x4df   :  { %v1680_v29 = vpop.f32.mrb[29].mxu1 }
 0x4e0   :  { %v1681_v51 = vadd.f32 %v1680_v29, %v1679_v28  ;;  %v1682_v8 = vpop.f32.mrb[30].mxu1 }
 0x4e1   :  { %v1683_v30 = vpop.f32.mrb[31].mxu1 }
 0x4e2   :  { %v1455_v31 = vadd.f32 %v1681_v51, %v1598_v7 }
 0x4e4   :  { %1460 = vst [vmem:[#allocation5] sm:$0xff] %v1455_v31 }
 0x4e5   :  { %1915 = shalt.err (!%p1912_p12)
}
 0x4e6   :  { %s1916_s10 = scalar_lea.hbm %s2268_s11, 128 }
 0x4e7   :  { %p1917_p13 = scmp.ne.s32.totalorder %s2268_s11, %s1916_s10  ;;  %p1920_p0 = scmp.lt.u32.totalorder %s1916_s10, %s2268_s11 }
 0x4e9   :  { %p1922_p1 = pnand %p1920_p0, %p1917_p13 }
 0x4eb   :  { %1925 = shalt.err (!%p1922_p1)
}
 0x4ec   :  { %1470 = dma.vmem_to_hbm [thread:$0]  %s1468_s6, 128, %s2268_s11, [#allocation4]  }
 0x4ed   :  { %1928 = dma.done.wait [#allocation4], 128  }
 0x4ee   :  { %1929 = vsyncadd [#allocation4], 4294967168 }
 0x4ef   :  { %1474 = vsyncpa [#allocation3], 1 }
 0x4f0   :  { %1475 = vsyncpa [#allocation4], 1 }

</bundles_post_ra>
